<compile_context>
chip_gen: v7x
topology: tpu7x:2x2x1
jax: 0.10.0
libtpu: 0.0.40
codegen_flags: <defaults>
</compile_context>

<pallas_src>
import jax
import jax.numpy as jnp
from jax import lax
from jax.experimental import pallas as pl
from jax.experimental.pallas import tpu as pltpu


def _vmem_limit_bytes():
    """Generation-aware scoped-VMEM budget (flat 32 MiB throttles v5e/v6e;
    v7x only has 64 MiB physical per TensorCore)."""
    try:
        phys = pltpu.get_tpu_info().vmem_capacity_bytes
    except Exception:                      # info unavailable -> conservative
        return 32 * 1024 * 1024
    if phys <= 64 * 1024 * 1024:           # v7x-class: 64 MiB physical
        return 48 * 1024 * 1024
    return 64 * 1024 * 1024                # v5e / v6e: 128 MiB physical


def _pick_row_tile(B, max_tile):
    """Largest multiple of 16 <= max_tile dividing B (16 keeps the bf16 output
    blocks on native (16,128) sublane tiles); else the full batch
    (a full-extent block dim is always legal)."""
    t = min(max_tile, B)
    t -= t % 16
    while t >= 16:
        if B % t == 0:
            return t
        t -= 16
    return B


def _pick_col_tile(B, max_tile):
    """Largest multiple of 128 <= max_tile dividing B (lane-dense, unmasked
    stores); else the full batch.  This also removes the silent data drop the
    old fixed tn=128 had when B was not a multiple of 128."""
    t = min(max_tile, B)
    t -= t % 128
    while t >= 128:
        if B % t == 0:
            return t
        t -= 128
    return B


def _l2_normalize(x):
    # torch: x / x.norm(dim=1, keepdim=True).  rsqrt+mul -> single EUP op.
    # No eps on purpose, matching PyTorch semantics (all-zero row -> NaN).
    return x * lax.rsqrt(jnp.sum(x * x, axis=-1, keepdims=True))


def _proj_kernel(img_ref, txt_ref,
                 wi1_ref, bi1_ref, wi2_ref, bi2_ref,
                 wt1_ref, bt1_ref, wt2_ref, bt2_ref,
                 img_feat_ref, txt_feat_ref,
                 img_proj_ref, txt_proj_ref,
                 img_proj_bf16_ref, txt_proj_bf16_ref):
    # Backbone embeddings -> float32, L2 normalized (dim=1).
    img = _l2_normalize(img_ref[...].astype(jnp.float32))
    txt = _l2_normalize(txt_ref[...].astype(jnp.float32))

    def mlp(x_f32, w1_ref, b1_ref, w2_ref, b2_ref):
        # Weights are resident bf16 [D_in, D_out].  Cast the activations to
        # bf16 instead of upcasting the weights: bf16 x bf16 matmul with f32
        # accumulation runs at full MXU rate with no per-step VALU casts.
        h = jnp.dot(x_f32.astype(jnp.bfloat16), w1_ref[...],
                    preferred_element_type=jnp.float32) + b1_ref[...]
        h = jnp.maximum(h, 0.0)
        return jnp.dot(h.astype(jnp.bfloat16), w2_ref[...],
                       preferred_element_type=jnp.float32) + b2_ref[...]

    p_i = _l2_normalize(mlp(img, wi1_ref, bi1_ref, wi2_ref, bi2_ref))
    p_t = _l2_normalize(mlp(txt, wt1_ref, bt1_ref, wt2_ref, bt2_ref))

    img_feat_ref[...] = img
    txt_feat_ref[...] = txt
    img_proj_ref[...] = p_i
    txt_proj_ref[...] = p_t
    # bf16 copies of the (L2-normalized, |x|<=1) projections feed the
    # similarity matmul: half the re-streamed HBM bytes, bf16 MXU rate.
    img_proj_bf16_ref[...] = p_i.astype(jnp.bfloat16)
    txt_proj_bf16_ref[...] = p_t.astype(jnp.bfloat16)


def _sim_kernel(pi_ref, pt_ref, sim_ref):
    # image_proj @ text_proj.T without materializing a transpose: contract on
    # K (axis 1) of both bf16 operands, accumulate f32 on the MXU.
    sim_ref[...] = lax.dot_general(
        pi_ref[...], pt_ref[...],
        dimension_numbers=(((1,), (1,)), ((), ())),
        preferred_element_type=jnp.float32)


def prepare_params(params):
    """One-time parameter layout (do at load time, NOT per forward call):
    transpose Linear weights to [D_in, D_out], cast weights to bf16
    (accumulation stays f32 in-kernel), reshape biases to [1, D] f32 rows."""
    D = params["image_proj.0.weight"].shape[0]
    bf16, f32 = jnp.bfloat16, jnp.float32
    return dict(
        wi1_t=params["image_proj.0.weight"].T.astype(bf16),
        wi2_t=params["image_proj.2.weight"].T.astype(bf16),
        wt1_t=params["text_proj.0.weight"].T.astype(bf16),
        wt2_t=params["text_proj.2.weight"].T.astype(bf16),
        bi1=params["image_proj.0.bias"].reshape(1, D).astype(f32),
        bi2=params["image_proj.2.bias"].reshape(1, D).astype(f32),
        bt1=params["text_proj.0.bias"].reshape(1, D).astype(f32),
        bt2=params["text_proj.2.bias"].reshape(1, D).astype(f32),
    )


def clip_finetuner_forward(image_features, text_features, prepared, *, tm=512):
    """Pallas head on pre-extracted CLIP embeddings.

    `prepared` comes from prepare_params().  `tm` is the *maximum* batch tile;
    the actual tiles are the largest divisors of B that satisfy TPU layout
    rules (full-extent fallback keeps any B correct).
    """
    B, D = image_features.shape
    assert text_features.shape == (B, D)
    f32, bf16 = jnp.float32, jnp.bfloat16
    vmem_limit = _vmem_limit_bytes()

    row_tile = _pick_row_tile(B, tm)

    w_spec = pl.BlockSpec((D, D), lambda i: (0, 0))    # resident across grid
    b_spec = pl.BlockSpec((1, D), lambda i: (0, 0))
    x_spec = pl.BlockSpec((row_tile, D), lambda i: (i, 0))

    weight_bytes = 4 * D * D * 2 + 4 * D * 4
    io_bytes = 2 * B * D * 4 + 4 * B * D * 4 + 2 * B * D * 2
    proj_cost = pl.CostEstimate(
        flops=4 * 2 * B * D * D,
        transcendentals=4 * B,             # one rsqrt per row per normalize
        bytes_accessed=weight_bytes + io_bytes,
    )

    (img_feat, txt_feat, img_proj, txt_proj,
     img_proj_bf16, txt_proj_bf16) = pl.pallas_call(
        _proj_kernel,
        out_shape=(jax.ShapeDtypeStruct((B, D), f32),
                   jax.ShapeDtypeStruct((B, D), f32),
                   jax.ShapeDtypeStruct((B, D), f32),
                   jax.ShapeDtypeStruct((B, D), f32),
                   jax.ShapeDtypeStruct((B, D), bf16),
                   jax.ShapeDtypeStruct((B, D), bf16)),
        grid=(B // row_tile,),
        in_specs=[x_spec, x_spec,
                  w_spec, b_spec, w_spec, b_spec,
                  w_spec, b_spec, w_spec, b_spec],
        out_specs=tuple([x_spec] * 6),
        compiler_params=pltpu.CompilerParams(
            dimension_semantics=("parallel",),
            vmem_limit_bytes=vmem_limit),
        cost_estimate=proj_cost,
    )(image_features, text_features,
      prepared["wi1_t"], prepared["bi1"], prepared["wi2_t"], prepared["bi2"],
      prepared["wt1_t"], prepared["bt1"], prepared["wt2_t"], prepared["bt2"])

    # Similarity in [sim_tm, sim_tn] tiles of the B x B output, bf16 inputs.
    sim_tm = row_tile
    sim_tn = _pick_col_tile(B, tm)
    sim_cost = pl.CostEstimate(
        flops=2 * B * B * D,
        transcendentals=0,
        bytes_accessed=2 * B * D * 2 + B * B * 4,
    )

    similarity = pl.pallas_call(
        _sim_kernel,
        out_shape=jax.ShapeDtypeStruct((B, B), f32),
        grid=(B // sim_tm, B // sim_tn),
        in_specs=[pl.BlockSpec((sim_tm, D), lambda i, j: (i, 0)),
                  pl.BlockSpec((sim_tn, D), lambda i, j: (j, 0))],
        out_specs=pl.BlockSpec((sim_tm, sim_tn), lambda i, j: (i, j)),
        compiler_params=pltpu.CompilerParams(
            dimension_semantics=("parallel", "parallel"),
            vmem_limit_bytes=vmem_limit),
        cost_estimate=sim_cost,
    )(img_proj_bf16, txt_proj_bf16)

    return {
        "image_features": img_feat,
        "text_features": txt_feat,
        "image_features_proj": img_proj,
        "text_features_proj": txt_proj,
        "similarity": similarity,
    }


def _init_params(key, D):
    """Deterministic synthetic init for the projection-head Linear layers
    (PyTorch convention: W is [out, in], b is [out])."""
    names = [
        ("image_proj.0.weight", (D, D)), ("image_proj.0.bias", (D,)),
        ("image_proj.2.weight", (D, D)), ("image_proj.2.bias", (D,)),
        ("text_proj.0.weight", (D, D)), ("text_proj.0.bias", (D,)),
        ("text_proj.2.weight", (D, D)), ("text_proj.2.bias", (D,)),
    ]
    params = {}
    for name, shape in names:
        key, sub = jax.random.split(key)
        params[name] = (0.02 * jax.random.normal(sub, shape)).astype(jnp.float32)
    return params


def _reference(image_features, text_features, params):
    """Pure-JAX f32 reference of the same head (sanity check)."""
    def l2n(x):
        return x / jnp.sqrt(jnp.sum(x * x, axis=-1, keepdims=True))

    img = l2n(image_features.astype(jnp.float32))
    txt = l2n(text_features.astype(jnp.float32))

    def mlp(x, w1, b1, w2, b2):
        h = jnp.maximum(x @ w1.T + b1, 0.0)
        return h @ w2.T + b2

    p_i = l2n(mlp(img, params["image_proj.0.weight"], params["image_proj.0.bias"],
                  params["image_proj.2.weight"], params["image_proj.2.bias"]))
    p_t = l2n(mlp(txt, params["text_proj.0.weight"], params["text_proj.0.bias"],
                  params["text_proj.2.weight"], params["text_proj.2.bias"]))
    return {
        "image_features": img,
        "text_features": txt,
        "image_features_proj": p_i,
        "text_features_proj": p_t,
        "similarity": p_i @ p_t.T,
    }


if __name__ == "__main__":
    # Small, lane-aligned shapes; tm=16 exercises a real multi-step batch grid
    # (proj grid = 2 steps, sim grid = (2, 1)).
    B, D = 32, 128

    key = jax.random.PRNGKey(0)
    k_img, k_txt, k_param = jax.random.split(key, 3)

    # Synthetic "CLIP backbone" pooled embeddings.
    image_features = jax.random.normal(k_img, (B, D), dtype=jnp.float32)
    text_features = jax.random.normal(k_txt, (B, D), dtype=jnp.float32)
    params = _init_params(k_param, D)

    prepared = prepare_params(params)   # one-time layout work, outside the hot path

    out = clip_finetuner_forward(image_features, text_features, prepared, tm=16)
    out = jax.tree_util.tree_map(jax.block_until_ready, out)

    ref = _reference(image_features, text_features, params)
    # Proj / similarity tolerances are loosened for bf16 weights + activations
    # (f32 accumulation); normalization path stays f32.
    tol = {"image_features": 1e-4, "text_features": 1e-4,
           "image_features_proj": 2e-2, "text_features_proj": 2e-2,
           "similarity": 2e-2}
    for name, ref_val in ref.items():
        assert jnp.allclose(out[name], ref_val, atol=tol[name], rtol=tol[name]), name

    print("KERNEL_OK")
</pallas_src>

<mosaic_0001>
module attributes {stable_mosaic.version = 11 : i64} {
  func.func @_proj_kernel(%arg0: i32, %arg1: memref<16x128xf32, #tpu.memory_space<vmem>>, %arg2: memref<16x128xf32, #tpu.memory_space<vmem>>, %arg3: memref<128x128xbf16, #tpu.memory_space<vmem>>, %arg4: memref<1x128xf32, #tpu.memory_space<vmem>>, %arg5: memref<128x128xbf16, #tpu.memory_space<vmem>>, %arg6: memref<1x128xf32, #tpu.memory_space<vmem>>, %arg7: memref<128x128xbf16, #tpu.memory_space<vmem>>, %arg8: memref<1x128xf32, #tpu.memory_space<vmem>>, %arg9: memref<128x128xbf16, #tpu.memory_space<vmem>>, %arg10: memref<1x128xf32, #tpu.memory_space<vmem>>, %arg11: memref<16x128xf32, #tpu.memory_space<vmem>>, %arg12: memref<16x128xf32, #tpu.memory_space<vmem>>, %arg13: memref<16x128xf32, #tpu.memory_space<vmem>>, %arg14: memref<16x128xf32, #tpu.memory_space<vmem>>, %arg15: memref<16x128xbf16, #tpu.memory_space<vmem>>, %arg16: memref<16x128xbf16, #tpu.memory_space<vmem>>) attributes {dimension_semantics = [#tpu.dimension_semantics<parallel>], iteration_bounds = array<i64: 2>, scalar_prefetch = 0 : i64, scratch_operands = 0 : i64, tpu.core_type = #tpu.core_type<tc>, window_params = [{transform_indices = @transform_0, window_bounds = array<i64: 16, 128>}, {transform_indices = @transform_1, window_bounds = array<i64: 16, 128>}, {pipeline_mode = #tpu.pipeline_mode<synchronous>, transform_indices = @transform_2, window_bounds = array<i64: 128, 128>}, {pipeline_mode = #tpu.pipeline_mode<synchronous>, transform_indices = @transform_3, window_bounds = array<i64: 1, 128>}, {pipeline_mode = #tpu.pipeline_mode<synchronous>, transform_indices = @transform_4, window_bounds = array<i64: 128, 128>}, {pipeline_mode = #tpu.pipeline_mode<synchronous>, transform_indices = @transform_5, window_bounds = array<i64: 1, 128>}, {pipeline_mode = #tpu.pipeline_mode<synchronous>, transform_indices = @transform_6, window_bounds = array<i64: 128, 128>}, {pipeline_mode = #tpu.pipeline_mode<synchronous>, transform_indices = @transform_7, window_bounds = array<i64: 1, 128>}, {pipeline_mode = #tpu.pipeline_mode<synchronous>, transform_indices = @transform_8, window_bounds = array<i64: 128, 128>}, {pipeline_mode = #tpu.pipeline_mode<synchronous>, transform_indices = @transform_9, window_bounds = array<i64: 1, 128>}, {transform_indices = @transform_10, window_bounds = array<i64: 16, 128>}, {transform_indices = @transform_11, window_bounds = array<i64: 16, 128>}, {transform_indices = @transform_12, window_bounds = array<i64: 16, 128>}, {transform_indices = @transform_13, window_bounds = array<i64: 16, 128>}, {transform_indices = @transform_14, window_bounds = array<i64: 16, 128>}, {transform_indices = @transform_15, window_bounds = array<i64: 16, 128>}]} {
    %c0 = arith.constant 0 : index
    %c0_0 = arith.constant 0 : index
    %0 = vector.load %arg1[%c0, %c0_0] : memref<16x128xf32, #tpu.memory_space<vmem>>, vector<16x128xf32>
    %1 = arith.mulf %0, %0 : vector<16x128xf32>
    %cst = arith.constant dense<0.000000e+00> : vector<16xf32>
    %2 = vector.multi_reduction <add>, %1, %cst [1] : vector<16x128xf32> to vector<16xf32>
    %3 = vector.shape_cast %2 : vector<16xf32> to vector<16x1xf32>
    %4 = math.rsqrt %3 : vector<16x1xf32>
    %5 = vector.broadcast %4 : vector<16x1xf32> to vector<16x128xf32>
    %6 = arith.mulf %0, %5 : vector<16x128xf32>
    %c0_1 = arith.constant 0 : index
    %c0_2 = arith.constant 0 : index
    %7 = vector.load %arg2[%c0_1, %c0_2] : memref<16x128xf32, #tpu.memory_space<vmem>>, vector<16x128xf32>
    %8 = arith.mulf %7, %7 : vector<16x128xf32>
    %cst_3 = arith.constant dense<0.000000e+00> : vector<16xf32>
    %9 = vector.multi_reduction <add>, %8, %cst_3 [1] : vector<16x128xf32> to vector<16xf32>
    %10 = vector.shape_cast %9 : vector<16xf32> to vector<16x1xf32>
    %11 = math.rsqrt %10 : vector<16x1xf32>
    %12 = vector.broadcast %11 : vector<16x1xf32> to vector<16x128xf32>
    %13 = arith.mulf %7, %12 : vector<16x128xf32>
    %14 = arith.truncf %6 : vector<16x128xf32> to vector<16x128xbf16>
    %c0_4 = arith.constant 0 : index
    %c0_5 = arith.constant 0 : index
    %15 = vector.load %arg3[%c0_4, %c0_5] : memref<128x128xbf16, #tpu.memory_space<vmem>>, vector<128x128xbf16>
    %cst_6 = arith.constant dense<0.000000e+00> : vector<16x128xf32>
    %16 = tpu.matmul %14, %15, %cst_6 {dimension_numbers = #tpu.dot_dimension_numbers<[1], [0], [0], [1], [0, 0, 1, 1], [], []>} : vector<16x128xbf16>, vector<128x128xbf16>, vector<16x128xf32> -> vector<16x128xf32>
    %c0_7 = arith.constant 0 : index
    %c0_8 = arith.constant 0 : index
    %17 = vector.load %arg4[%c0_7, %c0_8] : memref<1x128xf32, #tpu.memory_space<vmem>>, vector<1x128xf32>
    %18 = vector.broadcast %17 : vector<1x128xf32> to vector<16x128xf32>
    %19 = arith.addf %16, %18 : vector<16x128xf32>
    %cst_9 = arith.constant 0.000000e+00 : f32
    %20 = vector.broadcast %cst_9 : f32 to vector<16x128xf32>
    %21 = arith.maximumf %19, %20 : vector<16x128xf32>
    %22 = arith.truncf %21 : vector<16x128xf32> to vector<16x128xbf16>
    %c0_10 = arith.constant 0 : index
    %c0_11 = arith.constant 0 : index
    %23 = vector.load %arg5[%c0_10, %c0_11] : memref<128x128xbf16, #tpu.memory_space<vmem>>, vector<128x128xbf16>
    %cst_12 = arith.constant dense<0.000000e+00> : vector<16x128xf32>
    %24 = tpu.matmul %22, %23, %cst_12 {dimension_numbers = #tpu.dot_dimension_numbers<[1], [0], [0], [1], [0, 0, 1, 1], [], []>} : vector<16x128xbf16>, vector<128x128xbf16>, vector<16x128xf32> -> vector<16x128xf32>
    %c0_13 = arith.constant 0 : index
    %c0_14 = arith.constant 0 : index
    %25 = vector.load %arg6[%c0_13, %c0_14] : memref<1x128xf32, #tpu.memory_space<vmem>>, vector<1x128xf32>
    %26 = vector.broadcast %25 : vector<1x128xf32> to vector<16x128xf32>
    %27 = arith.addf %24, %26 : vector<16x128xf32>
    %28 = arith.mulf %27, %27 : vector<16x128xf32>
    %cst_15 = arith.constant dense<0.000000e+00> : vector<16xf32>
    %29 = vector.multi_reduction <add>, %28, %cst_15 [1] : vector<16x128xf32> to vector<16xf32>
    %30 = vector.shape_cast %29 : vector<16xf32> to vector<16x1xf32>
    %31 = math.rsqrt %30 : vector<16x1xf32>
    %32 = vector.broadcast %31 : vector<16x1xf32> to vector<16x128xf32>
    %33 = arith.mulf %27, %32 : vector<16x128xf32>
    %34 = arith.truncf %13 : vector<16x128xf32> to vector<16x128xbf16>
    %c0_16 = arith.constant 0 : index
    %c0_17 = arith.constant 0 : index
    %35 = vector.load %arg7[%c0_16, %c0_17] : memref<128x128xbf16, #tpu.memory_space<vmem>>, vector<128x128xbf16>
    %cst_18 = arith.constant dense<0.000000e+00> : vector<16x128xf32>
    %36 = tpu.matmul %34, %35, %cst_18 {dimension_numbers = #tpu.dot_dimension_numbers<[1], [0], [0], [1], [0, 0, 1, 1], [], []>} : vector<16x128xbf16>, vector<128x128xbf16>, vector<16x128xf32> -> vector<16x128xf32>
    %c0_19 = arith.constant 0 : index
    %c0_20 = arith.constant 0 : index
    %37 = vector.load %arg8[%c0_19, %c0_20] : memref<1x128xf32, #tpu.memory_space<vmem>>, vector<1x128xf32>
    %38 = vector.broadcast %37 : vector<1x128xf32> to vector<16x128xf32>
    %39 = arith.addf %36, %38 : vector<16x128xf32>
    %cst_21 = arith.constant 0.000000e+00 : f32
    %40 = vector.broadcast %cst_21 : f32 to vector<16x128xf32>
    %41 = arith.maximumf %39, %40 : vector<16x128xf32>
    %42 = arith.truncf %41 : vector<16x128xf32> to vector<16x128xbf16>
    %c0_22 = arith.constant 0 : index
    %c0_23 = arith.constant 0 : index
    %43 = vector.load %arg9[%c0_22, %c0_23] : memref<128x128xbf16, #tpu.memory_space<vmem>>, vector<128x128xbf16>
    %cst_24 = arith.constant dense<0.000000e+00> : vector<16x128xf32>
    %44 = tpu.matmul %42, %43, %cst_24 {dimension_numbers = #tpu.dot_dimension_numbers<[1], [0], [0], [1], [0, 0, 1, 1], [], []>} : vector<16x128xbf16>, vector<128x128xbf16>, vector<16x128xf32> -> vector<16x128xf32>
    %c0_25 = arith.constant 0 : index
    %c0_26 = arith.constant 0 : index
    %45 = vector.load %arg10[%c0_25, %c0_26] : memref<1x128xf32, #tpu.memory_space<vmem>>, vector<1x128xf32>
    %46 = vector.broadcast %45 : vector<1x128xf32> to vector<16x128xf32>
    %47 = arith.addf %44, %46 : vector<16x128xf32>
    %48 = arith.mulf %47, %47 : vector<16x128xf32>
    %cst_27 = arith.constant dense<0.000000e+00> : vector<16xf32>
    %49 = vector.multi_reduction <add>, %48, %cst_27 [1] : vector<16x128xf32> to vector<16xf32>
    %50 = vector.shape_cast %49 : vector<16xf32> to vector<16x1xf32>
    %51 = math.rsqrt %50 : vector<16x1xf32>
    %52 = vector.broadcast %51 : vector<16x1xf32> to vector<16x128xf32>
    %53 = arith.mulf %47, %52 : vector<16x128xf32>
    %c0_28 = arith.constant 0 : index
    %c0_29 = arith.constant 0 : index
    %54 = vector.load %arg11[%c0_28, %c0_29] : memref<16x128xf32, #tpu.memory_space<vmem>>, vector<16x128xf32>
    tpu.vector_store %arg11[%c0_28, %c0_29], %6 {strides = array<i32>} : memref<16x128xf32, #tpu.memory_space<vmem>>, vector<16x128xf32>,
    %c0_30 = arith.constant 0 : index
    %c0_31 = arith.constant 0 : index
    %55 = vector.load %arg12[%c0_30, %c0_31] : memref<16x128xf32, #tpu.memory_space<vmem>>, vector<16x128xf32>
    tpu.vector_store %arg12[%c0_30, %c0_31], %13 {strides = array<i32>} : memref<16x128xf32, #tpu.memory_space<vmem>>, vector<16x128xf32>,
    %c0_32 = arith.constant 0 : index
    %c0_33 = arith.constant 0 : index
    %56 = vector.load %arg13[%c0_32, %c0_33] : memref<16x128xf32, #tpu.memory_space<vmem>>, vector<16x128xf32>
    tpu.vector_store %arg13[%c0_32, %c0_33], %33 {strides = array<i32>} : memref<16x128xf32, #tpu.memory_space<vmem>>, vector<16x128xf32>,
    %c0_34 = arith.constant 0 : index
    %c0_35 = arith.constant 0 : index
    %57 = vector.load %arg14[%c0_34, %c0_35] : memref<16x128xf32, #tpu.memory_space<vmem>>, vector<16x128xf32>
    tpu.vector_store %arg14[%c0_34, %c0_35], %53 {strides = array<i32>} : memref<16x128xf32, #tpu.memory_space<vmem>>, vector<16x128xf32>,
    %58 = arith.truncf %33 : vector<16x128xf32> to vector<16x128xbf16>
    %c0_36 = arith.constant 0 : index
    %c0_37 = arith.constant 0 : index
    %59 = vector.load %arg15[%c0_36, %c0_37] : memref<16x128xbf16, #tpu.memory_space<vmem>>, vector<16x128xbf16>
    tpu.vector_store %arg15[%c0_36, %c0_37], %58 {strides = array<i32>} : memref<16x128xbf16, #tpu.memory_space<vmem>>, vector<16x128xbf16>,
    %60 = arith.truncf %53 : vector<16x128xf32> to vector<16x128xbf16>
    %c0_38 = arith.constant 0 : index
    %c0_39 = arith.constant 0 : index
    %61 = vector.load %arg16[%c0_38, %c0_39] : memref<16x128xbf16, #tpu.memory_space<vmem>>, vector<16x128xbf16>
    tpu.vector_store %arg16[%c0_38, %c0_39], %60 {strides = array<i32>} : memref<16x128xbf16, #tpu.memory_space<vmem>>, vector<16x128xbf16>,
    return
  }
  func.func @transform_0(%arg0: i32) -> (i32, i32) {
    %c0_i32 = arith.constant 0 : i32
    %c0_i32_0 = arith.constant 0 : i32
    return %arg0, %c0_i32 : i32, i32
  }
  func.func @transform_1(%arg0: i32) -> (i32, i32) {
    %c0_i32 = arith.constant 0 : i32
    %c0_i32_0 = arith.constant 0 : i32
    return %arg0, %c0_i32 : i32, i32
  }
  func.func @transform_2(%arg0: i32) -> (i32, i32) {
    %c0_i32 = arith.constant 0 : i32
    %c0_i32_0 = arith.constant 0 : i32
    %c0_i32_1 = arith.constant 0 : i32
    return %c0_i32, %c0_i32_0 : i32, i32
  }
  func.func @transform_3(%arg0: i32) -> (i32, i32) {
    %c0_i32 = arith.constant 0 : i32
    %c0_i32_0 = arith.constant 0 : i32
    %c0_i32_1 = arith.constant 0 : i32
    return %c0_i32, %c0_i32_0 : i32, i32
  }
  func.func @transform_4(%arg0: i32) -> (i32, i32) {
    %c0_i32 = arith.constant 0 : i32
    %c0_i32_0 = arith.constant 0 : i32
    %c0_i32_1 = arith.constant 0 : i32
    return %c0_i32, %c0_i32_0 : i32, i32
  }
  func.func @transform_5(%arg0: i32) -> (i32, i32) {
    %c0_i32 = arith.constant 0 : i32
    %c0_i32_0 = arith.constant 0 : i32
    %c0_i32_1 = arith.constant 0 : i32
    return %c0_i32, %c0_i32_0 : i32, i32
  }
  func.func @transform_6(%arg0: i32) -> (i32, i32) {
    %c0_i32 = arith.constant 0 : i32
    %c0_i32_0 = arith.constant 0 : i32
    %c0_i32_1 = arith.constant 0 : i32
    return %c0_i32, %c0_i32_0 : i32, i32
  }
  func.func @transform_7(%arg0: i32) -> (i32, i32) {
    %c0_i32 = arith.constant 0 : i32
    %c0_i32_0 = arith.constant 0 : i32
    %c0_i32_1 = arith.constant 0 : i32
    return %c0_i32, %c0_i32_0 : i32, i32
  }
  func.func @transform_8(%arg0: i32) -> (i32, i32) {
    %c0_i32 = arith.constant 0 : i32
    %c0_i32_0 = arith.constant 0 : i32
    %c0_i32_1 = arith.constant 0 : i32
    return %c0_i32, %c0_i32_0 : i32, i32
  }
  func.func @transform_9(%arg0: i32) -> (i32, i32) {
    %c0_i32 = arith.constant 0 : i32
    %c0_i32_0 = arith.constant 0 : i32
    %c0_i32_1 = arith.constant 0 : i32
    return %c0_i32, %c0_i32_0 : i32, i32
  }
  func.func @transform_10(%arg0: i32) -> (i32, i32) {
    %c0_i32 = arith.constant 0 : i32
    %c0_i32_0 = arith.constant 0 : i32
    return %arg0, %c0_i32 : i32, i32
  }
  func.func @transform_11(%arg0: i32) -> (i32, i32) {
    %c0_i32 = arith.constant 0 : i32
    %c0_i32_0 = arith.constant 0 : i32
    return %arg0, %c0_i32 : i32, i32
  }
  func.func @transform_12(%arg0: i32) -> (i32, i32) {
    %c0_i32 = arith.constant 0 : i32
    %c0_i32_0 = arith.constant 0 : i32
    return %arg0, %c0_i32 : i32, i32
  }
  func.func @transform_13(%arg0: i32) -> (i32, i32) {
    %c0_i32 = arith.constant 0 : i32
    %c0_i32_0 = arith.constant 0 : i32
    return %arg0, %c0_i32 : i32, i32
  }
  func.func @transform_14(%arg0: i32) -> (i32, i32) {
    %c0_i32 = arith.constant 0 : i32
    %c0_i32_0 = arith.constant 0 : i32
    return %arg0, %c0_i32 : i32, i32
  }
  func.func @transform_15(%arg0: i32) -> (i32, i32) {
    %c0_i32 = arith.constant 0 : i32
    %c0_i32_0 = arith.constant 0 : i32
    return %arg0, %c0_i32 : i32, i32
  }
}

</mosaic_0001>

<bundles_post_ra>
// kernel: tpu_custom_call.1
= control target key start
LH: loop header
LB: loop body
LE: loop exit
PB: predicated region body
PF: predicated region fallthrough
CT: control target
= control target key end

     0   :  { %s3165_s0 = inlined_call_operand.hbm [shape: f32[32,128], index: 0, kind: input, shape index: {}]   ;;  %s3166_s1 = inlined_call_operand.hbm [shape: f32[32,128], index: 1, kind: input, shape index: {}]   ;;  %s3167_s2 = inlined_call_operand.hbm [shape: bf16[128,128], index: 2, kind: input, shape index: {}]   ;;  %s3168_s3 = inlined_call_operand.vmem [shape: f32[1,128], index: 3, kind: input, shape index: {}]   ;;  %s3169_s4 = inlined_call_operand.hbm [shape: bf16[128,128], index: 4, kind: input, shape index: {}]   ;;  %s3170_s5 = inlined_call_operand.vmem [shape: f32[1,128], index: 5, kind: input, shape index: {}]   ;;  %s3171_s6 = inlined_call_operand.hbm [shape: bf16[128,128], index: 6, kind: input, shape index: {}]   ;;  %s3172_s7 = inlined_call_operand.vmem [shape: f32[1,128], index: 7, kind: input, shape index: {}]   ;;  %s3173_s8 = inlined_call_operand.hbm [shape: bf16[128,128], index: 8, kind: input, shape index: {}]   ;;  %s3174_s9 = inlined_call_operand.vmem [shape: f32[1,128], index: 9, kind: input, shape index: {}]   ;;  %s3175_s10 = inlined_call_operand.hbm [shape: f32[32,128], index: 10, kind: output, shape index: {0}]   ;;  %s3176_s11 = inlined_call_operand.hbm [shape: f32[32,128], index: 11, kind: output, shape index: {1}]   ;;  %s3177_s12 = inlined_call_operand.hbm [shape: f32[32,128], index: 12, kind: output, shape index: {2}]   ;;  %s3178_s13 = inlined_call_operand.hbm [shape: f32[32,128], index: 13, kind: output, shape index: {3}]   ;;  %s3179_s14 = inlined_call_operand.hbm [shape: bf16[32,128], index: 14, kind: output, shape index: {4}]   ;;  %s3180_s15 = inlined_call_operand.hbm [shape: bf16[32,128], index: 15, kind: output, shape index: {5}]  }
   0x1   :  { %3196 = sst [smem:[#allocation33_spill]] %s3165_s0 }
   0x2   :  { %3197 = sst [smem:[#allocation34_spill]] %s3166_s1 }
   0x3   :  { %3198 = sst [smem:[#allocation35_spill]] %s3167_s2 }
   0x4   :  { %3199 = sst [smem:[#allocation36_spill]] %s3168_s3 }
   0x5   :  { %3200 = sst [smem:[#allocation37_spill]] %s3169_s4 }
   0x6   :  { %3201 = sst [smem:[#allocation38_spill]] %s3170_s5 }
   0x7   :  { %3202 = sst [smem:[#allocation39_spill]] %s3171_s6 }
   0x8   :  { %3203 = sst [smem:[#allocation40_spill]] %s3174_s9 }
   0x9   :  { %3204 = sst [smem:[#allocation41_spill]] %s3175_s10 }
   0xa   :  { %3205 = sst [smem:[#allocation42_spill]] %s3176_s11 }
   0xb   :  { %3206 = sst [smem:[#allocation43_spill]] %s3177_s12 }
   0xc   :  { %3207 = sst [smem:[#allocation44_spill]] %s3178_s13 }
   0xd   :  { %3208 = sst [smem:[#allocation45_spill]] %s3179_s14 }
   0xe   :  { %3209 = sst [smem:[#allocation46_spill]] %s3180_s15 }
   0xf   :  { %21 = vsyncpa [#allocation3], 0 }
  0x10   :  { %23 = vsyncpa [#allocation3 + $0x1], 0 }
  0x11   :  { %24 = vsyncpa [#allocation6], 0 }
  0x12   :  { %26 = vsyncpa [#allocation6 + $0x1], 0 }
  0x13   :  { %27 = vsyncpa [#allocation9], 0 }
  0x14   :  { %28 = vsyncpa [#allocation12], 0 }
  0x15   :  { %29 = vsyncpa [#allocation4], 0 }
  0x16   :  { %31 = vsyncpa [#allocation4 + $0x1], 0 }
  0x17   :  { %32 = vsyncpa [#allocation15], 0 }
  0x18   :  { %34 = vsyncpa [#allocation15 + $0x1], 0 }
  0x19   :  { %35 = vsyncpa [#allocation18], 0 }
  0x1a   :  { %37 = vsyncpa [#allocation18 + $0x1], 0 }
  0x1b   :  { %38 = vsyncpa [#allocation21], 0 }
  0x1c   :  { %40 = vsyncpa [#allocation21 + $0x1], 0  ;;  %s2509_s18 = smov 0   ;;  %s2511_s19 = smov 0  }
  0x1d   :  { %s2513_s20 = smov 0   ;;  %s2515_s21 = smov 0  }
  0x1e LB: > { %3210 = sst [smem:[#allocation31_spill]] %s2393_s18  ;;  %s2530_s22 = sadd.s32 4294967295, %s2405_s21   ;;  %s2405_s21 = sphi %s2515_s21, %s3254_s21   ;;  %s2401_s20 = sphi %s2513_s20, %s3253_s20   ;;  %s2397_s19 = sphi %s2511_s19, %s3252_s19   ;;  %s2393_s18 = sphi %s2509_s18, %s3251_s18  }
  0x1f   : > { %s3181_s23 = sadd.s32 4294967294, %s2405_s21   ;;  %p66_p0 = scmp.ne.s32.totalorder %s2397_s19, %s2393_s18 }
  0x20   : > { %p3187_p1 = scmp.eq.s32.totalorder %s2530_s22, 0  ;;  %p290_p3 = scmp.eq.s32.totalorder %s3181_s23, 1 }
  0x21   : > { %p1601_p5 = scmp.ge.s32.totalorder %s2405_s21, 1  ;;  %p427_p7 = scmp.lt.s32.totalorder %s2405_s21, 3 }
  0x22   : > { %p2541_p4 = por %p3187_p1, %p66_p0  ;;  %p2546_p6 = por %p290_p3, %p66_p0 }
  0x23   : > { %p2551_p8 = pnand %p1601_p5, %p427_p7  ;;  %s2407_s27 = smov [#allocation7]  }
  0x24   : > { %s3211_s24 = scalar_select %p2541_p4, 1, 0 }
  0x25   : > { %s3212_s25 = scalar_select %p2546_p6, 1, 0 }
  0x26   : > { %s3214_s26 = scalar_select %p2551_p8, 1, 0 }
  0x27   : > { %3213 = sst [smem:[#allocation32_spill]] %s3212_s25  ;;  %s439_s28 = sshll.u32 %s2407_s27, 4  ;;  %s2555_s28 = int_to_ptr.vmem [resolvable:$true] %s439_s28 }
  0x28   : > { %p1856_p9 = pneg %p2551_p8  ;;  %s2408_s30 = smov [#allocation8]  }
  0x29   : > { %s455_s16 = sshll.u32 %s2408_s30, 4  ;;  %s2409_s17 = smov [#allocation10]   ;;  %s2566_s16 = int_to_ptr.vmem [resolvable:$true] %s455_s16 }
  0x2a   : > { %p2562_p11 = pnand %p1856_p9, %p3187_p1  ;;  %s2568_s23 = sshll.u32 %s2409_s17, 4  ;;  %s472_s23 = int_to_ptr.vmem [resolvable:$true] %s2568_s23 }
  0x2b   : > { %s3216_s2 = sld [smem:[#allocation35_spill]] }
  0x2c   : > { %p2578_p13 = pneg %p2562_p11 }
  0x31   : > { %s1999_s18 = scalar_lea.hbm %s3216_s2, 1024 }
  0x32   : > { %p2000_p12 = scmp.ne.s32.totalorder %s3216_s2, %s1999_s18  ;;  %p2006_p5 = scmp.lt.u32.totalorder %s1999_s18, %s3216_s2 }
  0x34   : > { %p2002_p0 = pnand %p2578_p13, %p2000_p12 }
  0x36   : > { %p2003_p3 = pneg %p2002_p0 }
  0x38   : > { %p2008_p7 = pnand %p2006_p5, %p2003_p3 }
  0x3a   : > { %2011 = shalt.err (!%p2008_p7)
}
  0x3b   : > { %s2012_s14 = scalar_lea.vmem %s2555_s28, 1024  ;;  %p2020_p2 = scmp.lt.s32.totalorder %s2555_s28, %s2555_s28 }
  0x3c   : > { %p2013_p9 = scmp.ne.s32.totalorder %s2555_s28, %s2012_s14  ;;  %p2021_p6 = scmp.lt.s32.totalorder %s2012_s14, %s2012_s14 }
  0x3e   : > { %p2015_p10 = pnand %p2013_p9, %p2578_p13  ;;  %p2022_p12 = por %p2021_p6, %p2020_p2 }
  0x40   : > { %p2016_p1 = pneg %p2015_p10 }
  0x42   : > { %p2023_p0 = pnand %p2022_p12, %p2016_p1 }
  0x44   : > { %2026 = shalt.err (!%p2023_p0)
}
  0x45   : > { %s2410_s15 = smov 64   ;;  %s2411_s18 = smov 4  }
  0x46   : > { %1859 = dma.hbm_to_vmem [thread:$0]  (!%p2562_p11), %s3216_s2, 1024, %s2555_s28, [#allocation6], %s2410_s15, %s2410_s15, %s2411_s18  }
  0x47   : > { %s3218_s4 = sld [smem:[#allocation37_spill]] }
  0x4d   : > { %s2027_s14 = scalar_lea.hbm %s3218_s4, 1024 }
  0x4e   : > { %p2028_p1 = scmp.ne.s32.totalorder %s3218_s4, %s2027_s14  ;;  %p2034_p10 = scmp.lt.u32.totalorder %s2027_s14, %s3218_s4 }
  0x50   : > { %p2030_p2 = pnand %p2028_p1, %p2578_p13 }
  0x52   : > { %p2031_p6 = pneg %p2030_p2 }
  0x54   : > { %p2036_p3 = pnand %p2034_p10, %p2031_p6 }
  0x56   : > { %2039 = shalt.err (!%p2036_p3)
}
  0x57   : > { %s2040_s28 = scalar_lea.vmem %s2566_s16, 1024  ;;  %p2048_p12 = scmp.lt.s32.totalorder %s2566_s16, %s2566_s16 }
  0x58   : > { %p2041_p5 = scmp.ne.s32.totalorder %s2566_s16, %s2040_s28  ;;  %p2049_p0 = scmp.lt.s32.totalorder %s2040_s28, %s2040_s28 }
  0x5a   : > { %p2043_p7 = pnand %p2041_p5, %p2578_p13  ;;  %p2050_p1 = por %p2049_p0, %p2048_p12 }
  0x5c   : > { %p2044_p9 = pneg %p2043_p7 }
  0x5e   : > { %p2051_p2 = pnand %p2050_p1, %p2044_p9 }
  0x60   : > { %2054 = shalt.err (!%p2051_p2)
}
  0x61   : > { %1862 = dma.hbm_to_vmem [thread:$0]  (!%p2562_p11), %s3218_s4, 1024, %s2566_s16, [#allocation9], %s2410_s15, %s2410_s15, %s2411_s18  }
  0x62   : > { %s3219_s6 = sld [smem:[#allocation39_spill]] }
  0x68   : > { %s2055_s25 = scalar_lea.hbm %s3219_s6, 1024 }
  0x69   : > { %p2056_p6 = scmp.ne.s32.totalorder %s3219_s6, %s2055_s25  ;;  %p2062_p5 = scmp.lt.u32.totalorder %s2055_s25, %s3219_s6 }
  0x6b   : > { %p2058_p10 = pnand %p2056_p6, %p2578_p13 }
  0x6d   : > { %p2059_p3 = pneg %p2058_p10 }
  0x6f   : > { %p2064_p7 = pnand %p2062_p5, %p2059_p3 }
  0x71   : > { %2067 = shalt.err (!%p2064_p7)
}
  0x72   : > { %s2068_s28 = scalar_lea.vmem %s472_s23, 1024  ;;  %p2076_p1 = scmp.lt.s32.totalorder %s472_s23, %s472_s23 }
  0x73   : > { %p2069_p9 = scmp.ne.s32.totalorder %s472_s23, %s2068_s28  ;;  %p2077_p2 = scmp.lt.s32.totalorder %s2068_s28, %s2068_s28 }
  0x75   : > { %p2071_p12 = pnand %p2069_p9, %p2578_p13  ;;  %p2078_p4 = por %p2077_p2, %p2076_p1 }
  0x77   : > { %p2072_p0 = pneg %p2071_p12 }
  0x79   : > { %p2079_p8 = pnand %p2078_p4, %p2072_p0 }
  0x7b   : > { %2082 = shalt.err (!%p2079_p8)
}
  0x7c   : > { %1865 = dma.hbm_to_vmem [thread:$0]  (!%p2562_p11), %s3219_s6, 1024, %s472_s23, [#allocation9], %s2410_s15, %s2410_s15, %s2411_s18  }
  0x7d   : > { %s2412_s10 = smov [#allocation11]   ;;  %s2083_s27 = scalar_lea.hbm %s3173_s8, 1024 }
  0x7e   : > { %s487_s11 = sshll.u32 %s2412_s10, 4  ;;  %p2084_p4 = scmp.ne.s32.totalorder %s3173_s8, %s2083_s27  ;;  %s488_s11 = int_to_ptr.vmem [resolvable:$true] %s487_s11 }
  0x7f   : > { %p2090_p10 = scmp.lt.u32.totalorder %s2083_s27, %s3173_s8 }
  0x80   : > { %p2086_p8 = pnand %p2084_p4, %p2578_p13 }
  0x82   : > { %p2087_p6 = pneg %p2086_p8 }
  0x84   : > { %p2092_p3 = pnand %p2090_p10, %p2087_p6 }
  0x86   : > { %2095 = shalt.err (!%p2092_p3)
}
  0x87   : > { %s2096_s23 = scalar_lea.vmem %s488_s11, 1024  ;;  %p2104_p12 = scmp.lt.s32.totalorder %s488_s11, %s488_s11 }
  0x88   : > { %p2097_p5 = scmp.ne.s32.totalorder %s488_s11, %s2096_s23  ;;  %p2105_p0 = scmp.lt.s32.totalorder %s2096_s23, %s2096_s23 }
  0x8a   : > { %p2099_p7 = pnand %p2097_p5, %p2578_p13  ;;  %p2106_p1 = por %p2105_p0, %p2104_p12 }
  0x8c   : > { %p2100_p9 = pneg %p2099_p7 }
  0x8e   : > { %p2107_p2 = pnand %p2106_p1, %p2100_p9 }
  0x90   : > { %2110 = shalt.err (!%p2107_p2)
}
  0x91   : > { %1868 = dma.hbm_to_vmem [thread:$0]  (!%p2562_p11), %s3173_s8, 1024, %s488_s11, [#allocation12], %s2410_s15, %s2410_s15, %s2411_s18  }
  0x92   : > { %s2672_s13 = sadd.s32 1, %s2405_s21   ;;  %s53_s29 = sadd.s32 1, %s2401_s20 }
  0x93   : > { %s50_s10 = ssub.s32 %s2405_s21, %s2672_s13  ;;  %p60_p13 = scmp.ne.s32.totalorder %s2401_s20, %s2397_s19 }
  0x94   : > { %p51_p4 = scmp.eq.s32.totalorder %s50_s10, 0  ;;  %p61_p8 = scmp.eq.s32.totalorder %s2405_s21, 0 }
  0x95   : > { %p3220_p6 = scmp.eq.s32.totalorder %s2530_s22, 1  ;;  %p1899_p3 = scmp.lt.s32.totalorder %s2405_s21, 2 }
  0x96   : > { %s2688_s25 = scalar_select %p51_p4, %s2401_s20, %s53_s29  }
  0x97   : > { %p2682_p10 = por %p3220_p6, %p60_p13  ;;  %p62_p5 = por %p61_p8, %p60_p13 }
  0x98   : > { %s504_s27 = sand.u32 1, %s2401_s20   ;;  %s1686_s15 = sshll.u32 %s2405_s21, 8 }
  0x99   : > { %s2691_s30 = sshll.u32 %s504_s27, 4  ;;  %s3222_s0 = sld [smem:[#allocation33_spill]] }
  0x9a   : > { %s508_s14 = scalar_lea.vmem [#allocation2], %s2691_s30  ;;  %p2704_p11 = pnand %p1899_p3, %p62_p5 }
  0x9b   : > { %s515_s28 = sshll.u32 %s508_s14, 4  ;;  %s2708_s16 = scalar_lea.sflag [#allocation3], %s504_s27  ;;  %s2702_s28 = int_to_ptr.vmem [resolvable:$true] %s515_s28 }
  0x9c   : > { %p2113_p9 = pneg %p2704_p11 }
  0x9f   : > { %s2699_s17 = scalar_lea.hbm %s3222_s0, %s1686_s15  ;;  %s2116_s18 = scalar_lea.hbm %s3222_s0, 512 }
  0xa0   : > { %s2111_s9 = scalar_lea.hbm %s2699_s17, 256  ;;  %p2117_p1 = scmp.lt.u32.totalorder %s2699_s17, %s3222_s0 }
  0xa1   : > { %p2112_p7 = scmp.ne.s32.totalorder %s2699_s17, %s2111_s9  ;;  %p2118_p2 = scmp.lt.u32.totalorder %s2116_s18, %s2111_s9 }
  0xa2   : > { %p2120_p4 = scmp.lt.u32.totalorder %s2111_s9, %s2699_s17 }
  0xa3   : > { %p2114_p12 = pnand %p2113_p9, %p2112_p7  ;;  %p2119_p13 = por %p2118_p2, %p2117_p1 }
  0xa5   : > { %p2115_p0 = pneg %p2114_p12  ;;  %p2121_p8 = por %p2120_p4, %p2119_p13 }
  0xa7   : > { %p2122_p6 = pnand %p2121_p8, %p2115_p0 }
  0xa9   : > { %2125 = shalt.err (!%p2122_p6)
}
  0xaa   : > { %s2126_s27 = scalar_lea.vmem %s2702_s28, 256  ;;  %s2413_s29 = smov [#allocation2]  }
  0xab   : > { %p2127_p3 = scmp.ne.s32.totalorder %s2702_s28, %s2126_s27  ;;  %s2131_s10 = sshll.u32 %s2413_s29, 4  ;;  %s2132_s10 = int_to_ptr.vmem [resolvable:$false] %s2131_s10 }
  0xac   : > { %s2133_s11 = scalar_lea.vmem %s2132_s10, 512  ;;  %p2134_p12 = scmp.lt.s32.totalorder %s2702_s28, %s2132_s10 }
  0xad   : > { %p2129_p5 = pnand %p2127_p3, %p2113_p9  ;;  %p2135_p1 = scmp.lt.s32.totalorder %s2133_s11, %s2126_s27 }
  0xaf   : > { %p2130_p7 = pneg %p2129_p5  ;;  %p2136_p2 = por %p2135_p1, %p2134_p12 }
  0xb1   : > { %p2137_p13 = pnand %p2136_p2, %p2130_p7 }
  0xb3   : > { %2140 = shalt.err (!%p2137_p13)
}
  0xb4   : > { %s2414_s9 = smov 128   ;;  %s2415_s18 = smov 8  }
  0xb5   : > { %1872 = dma.hbm_to_vmem [thread:$0]  (!%p2704_p11), %s2699_s17, 256, %s2702_s28, %s2708_s16, %s2414_s9, %s2414_s9, %s2415_s18  }
  0xb6   : > { %s3224_s1 = sld [smem:[#allocation34_spill]]  ;;  %s529_s10 = scalar_lea.vmem [#allocation5], %s2691_s30 }
  0xb7   : > { %s536_s11 = sshll.u32 %s529_s10, 4  ;;  %s525_s0 = sand.u32 1, %s2405_s21   ;;  %s2747_s11 = int_to_ptr.vmem [resolvable:$true] %s536_s11 }
  0xb8   : > { %s2750_s2 = scalar_lea.sflag [#allocation6], %s525_s0 }
  0xbc   : > { %s2744_s29 = scalar_lea.hbm %s3224_s1, %s1686_s15  ;;  %s2146_s28 = scalar_lea.hbm %s3224_s1, 512 }
  0xbd   : > { %s2141_s4 = scalar_lea.hbm %s2744_s29, 256  ;;  %p2147_p6 = scmp.lt.u32.totalorder %s2744_s29, %s3224_s1 }
  0xbe   : > { %p2142_p0 = scmp.ne.s32.totalorder %s2744_s29, %s2141_s4  ;;  %p2148_p3 = scmp.lt.u32.totalorder %s2146_s28, %s2141_s4 }
  0xbf   : > { %p2150_p7 = scmp.lt.u32.totalorder %s2141_s4, %s2744_s29 }
  0xc0   : > { %p2144_p4 = pnand %p2142_p0, %p2113_p9  ;;  %p2149_p5 = por %p2148_p3, %p2147_p6 }
  0xc2   : > { %p2145_p8 = pneg %p2144_p4  ;;  %p2151_p12 = por %p2150_p7, %p2149_p5 }
  0xc4   : > { %p2152_p1 = pnand %p2151_p12, %p2145_p8 }
  0xc6   : > { %2155 = shalt.err (!%p2152_p1)
}
  0xc7   : > { %s2156_s0 = scalar_lea.vmem %s2747_s11, 256  ;;  %s2416_s30 = smov [#allocation5]  }
  0xc8   : > { %p2157_p2 = scmp.ne.s32.totalorder %s2747_s11, %s2156_s0  ;;  %s2161_s27 = sshll.u32 %s2416_s30, 4  ;;  %s2162_s27 = int_to_ptr.vmem [resolvable:$false] %s2161_s27 }
  0xc9   : > { %s2163_s10 = scalar_lea.vmem %s2162_s27, 512  ;;  %p2164_p4 = scmp.lt.s32.totalorder %s2747_s11, %s2162_s27 }
  0xca   : > { %p2159_p13 = pnand %p2157_p2, %p2113_p9  ;;  %p2165_p6 = scmp.lt.s32.totalorder %s2163_s10, %s2156_s0 }
  0xcc   : > { %p2160_p0 = pneg %p2159_p13  ;;  %p2166_p3 = por %p2165_p6, %p2164_p4 }
  0xce   : > { %p2167_p5 = pnand %p2166_p3, %p2160_p0 }
  0xd0   : > { %2170 = shalt.err (!%p2167_p5)
}
  0xd1   : > { %1875 = dma.hbm_to_vmem [thread:$0]  (!%p2704_p11), %s2744_s29, 256, %s2747_s11, %s2750_s2, %s2414_s9, %s2414_s9, %s2415_s18  }
  0xd2   : > { %p3225_p9 = scmp.ne.s32.totalorder %s3214_s26, 0 }
  0xd3   : > { %s2782_s4 = sand.u32 (!%p3225_p9), 1, %s2397_s19   ;;  %p3226_p8 = scmp.ne.s32.totalorder (!%p3225_p9), %s3211_s24, 0 }
  0xd4   : > { %548 = sbr.rel (%p3225_p9) target bundleno = 1083 (0x43b), region = 60  ;;  %s2785_s17 = sshll.u32 (!%p3225_p9), %s2782_s4, 4 }
  0xd5   : > { %s551_s23 = scalar_lea.sflag (!%p3225_p9), [#allocation3], %s2782_s4  ;;  %s554_s15 = scalar_lea.vmem (!%p3225_p9), [#allocation2], %s2785_s17 }
  0xdb   : > { %2356 = dma.done.wait (%p3226_p8), %s551_s23, 256  }
  0xdc   : > { %2358 = vsyncadd (%p3226_p8), %s551_s23, 4294967040  ;;  %s2794_s2 = sand.u32 1, %s2530_s22   ;;  %s563_s9 = scalar_lea.vmem [#allocation5], %s2785_s17 }
  0xdd   : > { %s560_s26 = scalar_lea.sflag [#allocation6], %s2794_s2 }
  0xde   : > { %2360 = dma.done.wait (%p3226_p8), %s560_s26, 256  }
  0xdf   : > { %2362 = vsyncadd (%p3226_p8), %s560_s26, 4294967040  ;;  %p3227_p11 = scmp.eq.s32.totalorder %s2530_s22, 0 }
  0xe1   : > { %2364 = dma.done.wait (%p3227_p11), [#allocation6], 1024   ;;  %p3228_p7 = pmov %p3227_p11 }
  0xe3   : > { %2366 = vsyncadd (%p3228_p7), [#allocation6], 4294966272  ;;  %p3229_p12 = pmov %p3228_p7 }
  0xe4   : > { %p3230_p1 = pmov %p3228_p7 }
  0xe5   : > { %2368 = dma.done.wait (%p3229_p12), [#allocation9], 2048  }
  0xe6   : > { %2370 = vsyncadd (%p3230_p1), [#allocation9], 4294965248  ;;  %p3231_p2 = pmov %p3230_p1 }
  0xe7   : > { %p3232_p13 = pmov %p3230_p1 }
  0xe8   : > { %2372 = dma.done.wait (%p3231_p2), [#allocation12], 1024  }
  0xe9   : > { %2374 = vsyncadd (%p3232_p13), [#allocation12], 4294966272  ;;  %v2417_v0 = vmov 0.0   ;;  %v2816_v1 = vld [vmem:[%s554_s15] sm:$0xff]  ;;  %v2818_v2 = vld [vmem:[%s554_s15 + $0x8] sm:$0xff]  ;;  %vm2418_vm0 = vmmov 0  }
  0xea   : > { %1744 = vmatprep.subr.bf16.mxu0 %v2417_v0  ;;  %1764 = vmatprep.subr.bf16.mxu1 %v2417_v0  ;;  %v2820_v3 = vld [vmem:[%s563_s9] sm:$0xff]  ;;  %v667_v4 = vmul.f32 %v2816_v1, %v2816_v1  ;;  %v2826_v6 = vld [vmem:[%s563_s9 + $0x8] sm:$0xff]  ;;  %v668_v8 = vmul.f32 %v2818_v2, %v2818_v2  ;;  %s2853_s24 = scalar_lea.vmem [#allocation13], %s2785_s17  ;;  %s2857_s18 = scalar_lea.vmem [#allocation14], %s2785_s17 }
  0xeb   : > { %v679_v5 = vmul.f32 %v2820_v3, %v2820_v3  ;;  %v1951_v7 = vld [vmem:[#allocation7] sm:$0xff]   ;;  %v680_v9 = vmul.f32 %v2826_v6, %v2826_v6  ;;  %v1952_v10 = vld [vmem:[#allocation7 + $0x8] sm:$0xff]   ;;  %v1953_v11 = vld [vmem:[#allocation7 + $0x10] sm:$0xff]   ;;  %1760 = vmatprep.mubr.msk.bf16.mxu0 %vm2418_vm0, %v2417_v0  ;;  %1780 = vmatprep.mubr.msk.bf16.mxu1 %vm2418_vm0, %v2417_v0  ;;  %s3233_s3 = sld [smem:[#allocation36_spill]]  ;;  %s3234_s5 = sld [smem:[#allocation38_spill]] }
  0xec   : > { %669 = vadd.xlane.f32.xlu0 %v667_v4  ;;  %1745 = vmatpush3.bf16.msra.mxu0 %v1951_v7  ;;  %v1954_v12 = vld [vmem:[#allocation7 + $0x18] sm:$0xff]   ;;  %v1955_v13 = vld [vmem:[#allocation7 + $0x20] sm:$0xff]   ;;  %v1956_v14 = vld [vmem:[#allocation7 + $0x28] sm:$0xff]   ;;  %s3235_s10 = sld [smem:[#allocation40_spill]]  ;;  %s1232_s23 = sshll.u32 %s2853_s24, 4  ;;  %s2954_s23 = int_to_ptr.vmem [resolvable:$true] %s1232_s23 }
  0xed   : > { %681 = vadd.xlane.f32.xlu1 %v679_v5  ;;  %1746 = vmatprep.subr.bf16.mxu0 %v2417_v0  ;;  %v1957_v15 = vld [vmem:[#allocation7 + $0x30] sm:$0xff]   ;;  %v1958_v16 = vld [vmem:[#allocation7 + $0x38] sm:$0xff]   ;;  %v1967_v17 = vld [vmem:[#allocation8] sm:$0xff]   ;;  %s2914_s15 = sshll.u32 %s2530_s22, 8  ;;  %s3236_s29 = sld [smem:[#allocation42_spill]] }
  0xee   : > { %1765 = vmatpush3.bf16.msra.mxu1 %v1967_v17  ;;  %v1968_v18 = vld [vmem:[#allocation8 + $0x8] sm:$0xff]   ;;  %v1969_v19 = vld [vmem:[#allocation8 + $0x10] sm:$0xff]   ;;  %v1970_v20 = vld [vmem:[#allocation8 + $0x18] sm:$0xff]   ;;  %s1248_s28 = sshll.u32 %s2857_s18, 4  ;;  %s1199_s16 = scalar_lea.sflag [#allocation15], %s2794_s2  ;;  %s2923_s28 = int_to_ptr.vmem [resolvable:$true] %s1248_s28 }
  0xef   : > { %1766 = vmatprep.subr.bf16.mxu1 %v2417_v0  ;;  %v1971_v21 = vld [vmem:[#allocation8 + $0x20] sm:$0xff]   ;;  %v1972_v22 = vld [vmem:[#allocation8 + $0x28] sm:$0xff]   ;;  %v1961_v38 = vld [vmem:[#allocation10 + $0x10] sm:$0xff]   ;;  %s2171_s14 = scalar_lea.vmem %s2923_s28, 256  ;;  %s2419_s0 = smov [#allocation14]  }
  0xf0   : > { %671 = vadd.xlane.f32.xlu0 %v668_v8  ;;  %1747 = vmatpush3.bf16.msra.mxu0 %v1952_v10  ;;  %v1959_v34 = vld [vmem:[#allocation10] sm:$0xff]   ;;  %v1960_v37 = vld [vmem:[#allocation10 + $0x8] sm:$0xff]   ;;  %v1962_v39 = vld [vmem:[#allocation10 + $0x18] sm:$0xff]   ;;  %p2172_p0 = scmp.ne.s32.totalorder %s2923_s28, %s2171_s14  ;;  %s2175_s30 = sshll.u32 %s2419_s0, 4  ;;  %s2176_s30 = int_to_ptr.vmem [resolvable:$false] %s2175_s30 }
  0xf1   : > { %683 = vadd.xlane.f32.xlu1 %v680_v9  ;;  %1748 = vmatprep.subr.bf16.mxu0 %v2417_v0  ;;  %v1963_v40 = vld [vmem:[#allocation10 + $0x20] sm:$0xff]   ;;  %v1964_v41 = vld [vmem:[#allocation10 + $0x28] sm:$0xff]   ;;  %v1965_v42 = vld [vmem:[#allocation10 + $0x30] sm:$0xff]   ;;  %s2177_s27 = scalar_lea.vmem %s2176_s30, 512  ;;  %p2178_p3 = scmp.lt.s32.totalorder %s2923_s28, %s2176_s30 }
  0xf2   : > { %1767 = vmatpush3.bf16.msra.mxu1 %v1968_v18  ;;  %v1966_v43 = vld [vmem:[#allocation10 + $0x38] sm:$0xff]   ;;  %v1973_v45 = vld [vmem:[#allocation8 + $0x30] sm:$0xff]   ;;  %v1626_v47 = vld [vmem:[%s3233_s3] ss:$0 sm:$0xff]  ;;  %p2173_p4 = pnand %p2172_p0, %p2682_p10  ;;  %p2179_p5 = scmp.lt.s32.totalorder %s2177_s27, %s2171_s14 }
  0xf3   : > { %1768 = vmatprep.subr.bf16.mxu1 %v2417_v0  ;;  %v1974_v46 = vld [vmem:[#allocation8 + $0x38] sm:$0xff]   ;;  %v1975_v56 = vld [vmem:[#allocation11] sm:$0xff]   ;;  %v1976_v58 = vld [vmem:[#allocation11 + $0x8] sm:$0xff]   ;;  %s2920_s11 = scalar_lea.hbm %s3236_s29, %s2914_s15 }
  0xf4   : > { %1749 = vmatpush3.bf16.msra.mxu0 %v1953_v11  ;;  %v1977_v59 = vld [vmem:[#allocation11 + $0x10] sm:$0xff]   ;;  %v1978_v60 = vld [vmem:[#allocation11 + $0x18] sm:$0xff]   ;;  %v1979_v61 = vld [vmem:[#allocation11 + $0x20] sm:$0xff]   ;;  %p2174_p6 = pneg %p2173_p4  ;;  %p2180_p9 = por %p2179_p5, %p2178_p3 }
  0xf5   : > { %1750 = vmatprep.subr.bf16.mxu0 %v2417_v0  ;;  %v1980_v62 = vld [vmem:[#allocation11 + $0x28] sm:$0xff]   ;;  %v1644_v63 = vld [vmem:[%s3172_s7] ss:$0 sm:$0xff] }
  0xf6   : > { %1769 = vmatpush3.bf16.msra.mxu1 %v1969_v19  ;;  %p2181_p8 = pnand %p2180_p9, %p2174_p6 }
  0xf7   : > { %1770 = vmatprep.subr.bf16.mxu1 %v2417_v0 }
  0xf8   : > { %1751 = vmatpush3.bf16.msra.mxu0 %v1954_v12  ;;  %v1635_v12 = vld [vmem:[%s3234_s5] ss:$0 sm:$0xff] }
  0xf9   : > { %1752 = vmatprep.subr.bf16.mxu0 %v2417_v0 }
  0xfa   : > { %1771 = vmatpush3.bf16.msra.mxu1 %v1970_v20  ;;  %v1653_v20 = vld [vmem:[%s3235_s10] ss:$0 sm:$0xff] }
  0xfb   : > { %1772 = vmatprep.subr.bf16.mxu1 %v2417_v0 }
  0xfc   : > { %1753 = vmatpush3.bf16.msra.mxu0 %v1955_v13 }
  0xfd   : > { %1754 = vmatprep.subr.bf16.mxu0 %v2417_v0 }
  0xfe   : > { %1773 = vmatpush3.bf16.msra.mxu1 %v1971_v21 }
  0xff   : > { %1774 = vmatprep.subr.bf16.mxu1 %v2417_v0 }
 0x100   : > { %1755 = vmatpush3.bf16.msra.mxu0 %v1956_v14 }
 0x101   : > { %1756 = vmatprep.subr.bf16.mxu0 %v2417_v0 }
 0x102   : > { %1775 = vmatpush3.bf16.msra.mxu1 %v1972_v22 }
 0x103   : > { %1776 = vmatprep.subr.bf16.mxu1 %v2417_v0 }
 0x104   : > { %1757 = vmatpush3.bf16.msra.mxu0 %v1957_v15 }
 0x105   : > { %1758 = vmatprep.subr.bf16.mxu0 %v2417_v0 }
 0x106   : > { %1777 = vmatpush3.bf16.msra.mxu1 %v1973_v45 }
 0x107   : > { %1778 = vmatprep.subr.bf16.mxu1 %v2417_v0 }
 0x108   : > { %1759 = vmatpush3.bf16.msra.mxu0 %v1958_v16 }
 0x109   : > { %1784 = vmatprep.subr.bf16.mxu0 %v2417_v0 }
 0x10a   : > { %1779 = vmatpush3.bf16.msra.mxu1 %v1974_v46 }
 0x10b   : > { %1804 = vmatprep.subr.bf16.mxu1 %v2417_v0 }
 0x179   : > { %v670_v23 = vpop.xlane.xlu0 %669 }
 0x17a   : > { %v682_v24 = vpop.xlane.xlu1 %681  ;;  %1983 = vrsqrt.f32 %v670_v23 }
 0x17b   : > { %1985 = vrsqrt.f32 %v682_v24 }
 0x17d   : > { %v672_v25 = vpop.xlane.xlu0 %671 }
 0x17e   : > { %v684_v26 = vpop.xlane.xlu1 %683  ;;  %1987 = vrsqrt.f32 %v672_v25 }
 0x17f   : > { %1989 = vrsqrt.f32 %v684_v26 }
 0x184   : > { %v1984_v27 = vpop.eup %1983 }
 0x185   : > { %v1986_v28 = vpop.eup %1985  ;;  %v675_v29 = vmul.f32 %v1984_v27, %v2816_v1  ;;  %v1981_v1 = vld [vmem:[#allocation11 + $0x30] sm:$0xff]  }
 0x186   : > { %v687_v30 = vmul.f32 %v1986_v28, %v2820_v3 }
 0x187   : > { %1165 = vst [vmem:[%s2853_s24] sm:$0xff] %v675_v29 }
 0x188   : > { %v1988_v31 = vpop.eup %1987  ;;  %1167 = vst [vmem:[%s2857_s18] sm:$0xff] %v687_v30 }
 0x189   : > { %v1990_v32 = vpop.eup %1989  ;;  %v676_v33 = vmul.f32 %v1988_v31, %v2818_v2 }
 0x18a   : > { %v688_v35 = vmul.f32 %v1990_v32, %v2826_v6  ;;  %v1982_v6 = vld [vmem:[#allocation11 + $0x38] sm:$0xff]  }
 0x18b   : > { %v689_v36 = vpack.c.bf16 %v676_v33, %v675_v29  ;;  %1166 = vst [vmem:[%s2853_s24 + $0x8] sm:$0xff] %v676_v33 }
 0x18c   : > { %1168 = vst [vmem:[%s2857_s18 + $0x8] sm:$0xff] %v688_v35  ;;  %v927_v44 = vpack.c.bf16 %v688_v35, %v687_v30 }
 0x18d   : > { %1761 = vmatmul.mubr.bf16.vlgmr.msra.gmra.mrb[0].mxu0 %v689_v36 }
 0x18e   : > { %1785 = vmatpush3.bf16.msra.mxu0 %v1959_v34  ;;  %1800 = vmatprep.mubr.msk.bf16.mxu0 %vm2418_vm0, %v2417_v0 }
 0x18f   : > { %1786 = vmatprep.subr.bf16.mxu0 %v2417_v0 }
 0x192   : > { %1787 = vmatpush3.bf16.msra.mxu0 %v1960_v37 }
 0x193   : > { %1788 = vmatprep.subr.bf16.mxu0 %v2417_v0 }
 0x196   : > { %1789 = vmatpush3.bf16.msra.mxu0 %v1961_v38 }
 0x197   : > { %1790 = vmatprep.subr.bf16.mxu0 %v2417_v0 }
 0x19a   : > { %1791 = vmatpush3.bf16.msra.mxu0 %v1962_v39 }
 0x19b   : > { %1792 = vmatprep.subr.bf16.mxu0 %v2417_v0 }
 0x19e   : > { %1793 = vmatpush3.bf16.msra.mxu0 %v1963_v40 }
 0x19f   : > { %1794 = vmatprep.subr.bf16.mxu0 %v2417_v0 }
 0x1a2   : > { %1795 = vmatpush3.bf16.msra.mxu0 %v1964_v41 }
 0x1a3   : > { %1796 = vmatprep.subr.bf16.mxu0 %v2417_v0 }
 0x1a6   : > { %1797 = vmatpush3.bf16.msra.mxu0 %v1965_v42 }
 0x1a7   : > { %1798 = vmatprep.subr.bf16.mxu0 %v2417_v0 }
 0x1aa   : > { %1799 = vmatpush3.bf16.msra.mxu0 %v1966_v43 }
 0x1ad   : > { %1801 = vmatmul.mubr.bf16.vlgmr.msra.gmra.mrb[4].mxu0 %v927_v44 }
 0x260   : > { %v795_v48 = vpop.f32.mrb[0].mxu0 }
 0x261   : > { %v796_v49 = vadd.f32 %v1626_v47, %v795_v48  ;;  %v1762_v50 = vpop.f32.mrb[1].mxu0 }
 0x262   : > { %v798_v51 = vpop.f32.mrb[2].mxu0 }
 0x263   : > { %v799_v52 = vadd.f32 %v1626_v47, %v798_v51  ;;  %v1763_v53 = vpop.f32.mrb[3].mxu0  ;;  %v802_v54 = vmax.f32 %v796_v49, 0.0 }
 0x265   : > { %v803_v55 = vmax.f32 %v799_v52, 0.0 }
 0x267   : > { %v804_v57 = vpack.c.bf16 %v803_v55, %v802_v54 }
 0x269   : > { %1781 = vmatmul.mubr.bf16.vlgmr.msra.gmra.mrb[0].mxu1 %v804_v57 }
 0x26a   : > { %1805 = vmatpush3.bf16.msra.mxu1 %v1975_v56  ;;  %1820 = vmatprep.mubr.msk.bf16.mxu1 %vm2418_vm0, %v2417_v0 }
 0x26b   : > { %1806 = vmatprep.subr.bf16.mxu1 %v2417_v0 }
 0x26e   : > { %1807 = vmatpush3.bf16.msra.mxu1 %v1976_v58 }
 0x26f   : > { %1808 = vmatprep.subr.bf16.mxu1 %v2417_v0 }
 0x272   : > { %1809 = vmatpush3.bf16.msra.mxu1 %v1977_v59 }
 0x273   : > { %1810 = vmatprep.subr.bf16.mxu1 %v2417_v0 }
 0x276   : > { %1811 = vmatpush3.bf16.msra.mxu1 %v1978_v60 }
 0x277   : > { %1812 = vmatprep.subr.bf16.mxu1 %v2417_v0 }
 0x27a   : > { %1813 = vmatpush3.bf16.msra.mxu1 %v1979_v61 }
 0x27b   : > { %1814 = vmatprep.subr.bf16.mxu1 %v2417_v0 }
 0x27e   : > { %1815 = vmatpush3.bf16.msra.mxu1 %v1980_v62 }
 0x27f   : > { %1816 = vmatprep.subr.bf16.mxu1 %v2417_v0 }
 0x280   : > { %v1033_v2 = vpop.f32.mrb[4].mxu0 }
 0x281   : > { %v1034_v3 = vadd.f32 %v1644_v63, %v1033_v2  ;;  %v1802_v4 = vpop.f32.mrb[5].mxu0 }
 0x282   : > { %v1036_v5 = vpop.f32.mrb[6].mxu0  ;;  %1817 = vmatpush3.bf16.msra.mxu1 %v1981_v1 }
 0x283   : > { %v1037_v7 = vadd.f32 %v1644_v63, %v1036_v5  ;;  %v1803_v8 = vpop.f32.mrb[7].mxu0  ;;  %1818 = vmatprep.subr.bf16.mxu1 %v2417_v0  ;;  %v1040_v9 = vmax.f32 %v1034_v3, 0.0 }
 0x285   : > { %v1041_v10 = vmax.f32 %v1037_v7, 0.0 }
 0x286   : > { %1819 = vmatpush3.bf16.msra.mxu1 %v1982_v6 }
 0x287   : > { %v1042_v11 = vpack.c.bf16 %v1041_v10, %v1040_v9 }
 0x289   : > { %1821 = vmatmul.mubr.bf16.vlgmr.msra.gmra.mrb[4].mxu1 %v1042_v11 }
 0x33c   : > { %v910_v13 = vpop.f32.mrb[0].mxu1 }
 0x33d   : > { %v2893_v14 = vadd.f32 %v1635_v12, %v910_v13  ;;  %v1782_v15 = vpop.f32.mrb[1].mxu1 }
 0x33e   : > { %v913_v16 = vpop.f32.mrb[2].mxu1 }
 0x33f   : > { %v2895_v17 = vadd.f32 %v1635_v12, %v913_v16  ;;  %v1783_v18 = vpop.f32.mrb[3].mxu1  ;;  %v917_v0 = vmul.f32 %v2893_v14, %v2893_v14 }
 0x341   : > { %919 = vadd.xlane.f32.xlu0 %v917_v0  ;;  %v918_v19 = vmul.f32 %v2895_v17, %v2895_v17 }
 0x343   : > { %921 = vadd.xlane.f32.xlu1 %v918_v19 }
 0x35c   : > { %v1148_v21 = vpop.f32.mrb[4].mxu1 }
 0x35d   : > { %v2904_v22 = vadd.f32 %v1653_v20, %v1148_v21  ;;  %v1822_v23 = vpop.f32.mrb[5].mxu1 }
 0x35e   : > { %v1151_v24 = vpop.f32.mrb[6].mxu1 }
 0x35f   : > { %v2906_v25 = vadd.f32 %v1653_v20, %v1151_v24  ;;  %v1823_v26 = vpop.f32.mrb[7].mxu1  ;;  %v1155_v27 = vmul.f32 %v2904_v22, %v2904_v22 }
 0x361   : > { %1157 = vadd.xlane.f32.xlu0 %v1155_v27  ;;  %v1156_v28 = vmul.f32 %v2906_v25, %v2906_v25 }
 0x363   : > { %1159 = vadd.xlane.f32.xlu1 %v1156_v28 }
 0x364   : > { %2184 = shalt.err (!%p2181_p8)
}
 0x365   : > { %s2185_s18 = scalar_lea.hbm %s2920_s11, 256  ;;  %s2189_s9 = scalar_lea.hbm %s3236_s29, 512 }
 0x366   : > { %p2186_p11 = scmp.ne.s32.totalorder %s2920_s11, %s2185_s18  ;;  %p2190_p1 = scmp.lt.u32.totalorder %s2920_s11, %s3236_s29 }
 0x367   : > { %p2191_p2 = scmp.lt.u32.totalorder %s2189_s9, %s2185_s18  ;;  %p2193_p0 = scmp.lt.u32.totalorder %s2185_s18, %s2920_s11 }
 0x368   : > { %p2187_p7 = pnand %p2186_p11, %p2682_p10 }
 0x369   : > { %p2192_p13 = por %p2191_p2, %p2190_p1 }
 0x36a   : > { %p2188_p12 = pneg %p2187_p7 }
 0x36b   : > { %p2194_p4 = por %p2193_p0, %p2192_p13 }
 0x36d   : > { %p2195_p6 = pnand %p2194_p4, %p2188_p12 }
 0x36f   : > { %2198 = shalt.err (!%p2195_p6)
}
 0x370   : > { %s3193_s14 = smov 128   ;;  %s3194_s27 = smov 8  }
 0x371   : > { %1845 = dma.vmem_to_hbm [thread:$0]  (%p2682_p10), %s2923_s28, 256, %s2920_s11, %s1199_s16, %s3193_s14, %s3193_s14, %s3194_s27  }
 0x372   : > { %s3237_s26 = sld [smem:[#allocation41_spill]]  ;;  %s1194_s0 = scalar_lea.sflag [#allocation4], %s2782_s4 }
 0x373   : > { %s2199_s30 = scalar_lea.vmem %s2954_s23, 256  ;;  %s2422_s1 = smov [#allocation13]  }
 0x374   : > { %p2200_p3 = scmp.ne.s32.totalorder %s2954_s23, %s2199_s30  ;;  %s2203_s3 = sshll.u32 %s2422_s1, 4  ;;  %s2204_s3 = int_to_ptr.vmem [resolvable:$false] %s2203_s3 }
 0x375   : > { %s2205_s24 = scalar_lea.vmem %s2204_s3, 512  ;;  %p2206_p8 = scmp.lt.s32.totalorder %s2954_s23, %s2204_s3 }
 0x376   : > { %p2201_p5 = pnand %p2200_p3, %p2682_p10  ;;  %p2207_p11 = scmp.lt.s32.totalorder %s2205_s24, %s2199_s30 }
 0x378   : > { %s2960_s9 = scalar_lea.hbm %s3237_s26, %s2914_s15  ;;  %p2202_p9 = pneg %p2201_p5 }
 0x379   : > { %p2208_p7 = por %p2207_p11, %p2206_p8 }
 0x37b   : > { %p2209_p12 = pnand %p2208_p7, %p2202_p9 }
 0x37d   : > { %2212 = shalt.err (!%p2209_p12)
}
 0x37e   : > { %s2213_s11 = scalar_lea.hbm %s2960_s9, 256  ;;  %s2217_s1 = scalar_lea.hbm %s3237_s26, 512 }
 0x37f   : > { %p2214_p1 = scmp.ne.s32.totalorder %s2960_s9, %s2213_s11  ;;  %p2218_p0 = scmp.lt.u32.totalorder %s2960_s9, %s3237_s26 }
 0x380   : > { %p2219_p4 = scmp.lt.u32.totalorder %s2217_s1, %s2213_s11  ;;  %p2221_p3 = scmp.lt.u32.totalorder %s2213_s11, %s2960_s9 }
 0x381   : > { %p2215_p2 = pnand %p2214_p1, %p2682_p10 }
 0x382   : > { %p2220_p6 = por %p2219_p4, %p2218_p0 }
 0x383   : > { %p2216_p13 = pneg %p2215_p2 }
 0x384   : > { %p2222_p5 = por %p2221_p3, %p2220_p6 }
 0x386   : > { %p2223_p9 = pnand %p2222_p5, %p2216_p13 }
 0x388   : > { %2226 = shalt.err (!%p2223_p9)
}
 0x389   : > { %1844 = dma.vmem_to_hbm [thread:$0]  (%p2682_p10), %s2954_s23, 256, %s2960_s9, %s1194_s0, %s3193_s14, %s3193_s14, %s3194_s27  }
 0x38a   : > { %s634_s30 = scalar_lea.vmem [#allocation16], %s2785_s17  ;;  %s3238_s1 = sld [smem:[#allocation43_spill]] }
 0x38b   : > { %s1264_s24 = sshll.u32 %s634_s30, 4  ;;  %s2423_s9 = smov [#allocation16]   ;;  %s2999_s24 = int_to_ptr.vmem [resolvable:$true] %s1264_s24 }
 0x38c   : > { %s2227_s23 = scalar_lea.vmem %s2999_s24, 256  ;;  %s2231_s0 = sshll.u32 %s2423_s9, 4  ;;  %s2232_s0 = int_to_ptr.vmem [resolvable:$false] %s2231_s0 }
 0x38d   : > { %p2228_p8 = scmp.ne.s32.totalorder %s2999_s24, %s2227_s23  ;;  %s2233_s3 = scalar_lea.vmem %s2232_s0, 512 }
 0x38e   : > { %p2234_p12 = scmp.lt.s32.totalorder %s2999_s24, %s2232_s0  ;;  %p2235_p1 = scmp.lt.s32.totalorder %s2233_s3, %s2227_s23 }
 0x38f   : > { %p2229_p11 = pnand %p2228_p8, %p2682_p10 }
 0x390   : > { %s2997_s10 = scalar_lea.hbm %s3238_s1, %s2914_s15  ;;  %p2236_p2 = por %p2235_p1, %p2234_p12 }
 0x391   : > { %p2230_p7 = pneg %p2229_p11 }
 0x393   : > { %p2237_p13 = pnand %p2236_p2, %p2230_p7 }
 0x3ce   : > { %v920_v29 = vpop.xlane.xlu0 %919 }
 0x3cf   : > { %1991 = vrsqrt.f32 %v920_v29 }
 0x3d0   : > { %v922_v30 = vpop.xlane.xlu1 %921 }
 0x3d1   : > { %1993 = vrsqrt.f32 %v922_v30 }
 0x3d9   : > { %v1992_v31 = vpop.eup %1991 }
 0x3da   : > { %v925_v32 = vmul.f32 %v1992_v31, %v2893_v14 }
 0x3db   : > { %v1994_v33 = vpop.eup %1993 }
 0x3dc   : > { %1169 = vst [vmem:[%s634_s30] sm:$0xff] %v925_v32  ;;  %v926_v34 = vmul.f32 %v1994_v33, %v2895_v17 }
 0x3de   : > { %1170 = vst [vmem:[%s634_s30 + $0x8] sm:$0xff] %v926_v34  ;;  %v1701_v35 = vpack.c.bf16 %v926_v34, %v925_v32 }
 0x3df   : > { %2240 = shalt.err (!%p2237_p13)
}
 0x3e0   : > { %s2241_s30 = scalar_lea.hbm %s2997_s10, 256  ;;  %s2245_s9 = scalar_lea.hbm %s3238_s1, 512 }
 0x3e1   : > { %p2242_p0 = scmp.ne.s32.totalorder %s2997_s10, %s2241_s30  ;;  %p2246_p3 = scmp.lt.u32.totalorder %s2997_s10, %s3238_s1 }
 0x3e2   : > { %p2247_p5 = scmp.lt.u32.totalorder %s2245_s9, %s2241_s30  ;;  %p2249_p8 = scmp.lt.u32.totalorder %s2241_s30, %s2997_s10 }
 0x3e3   : > { %p2243_p4 = pnand %p2242_p0, %p2682_p10 }
 0x3e4   : > { %p2248_p9 = por %p2247_p5, %p2246_p3 }
 0x3e5   : > { %p2244_p6 = pneg %p2243_p4 }
 0x3e6   : > { %p2250_p11 = por %p2249_p8, %p2248_p9 }
 0x3e8   : > { %p2251_p7 = pnand %p2250_p11, %p2244_p6 }
 0x3ea   : > { %2254 = shalt.err (!%p2251_p7)
}
 0x3eb   : > { %1846 = dma.vmem_to_hbm [thread:$0]  (%p2682_p10), %s2999_s24, 256, %s2997_s10, %s1199_s16, %s3193_s14, %s3193_s14, %s3194_s27  }
 0x3ec   : > { %s3239_s11 = sshll.u32 %s2782_s4, 3  ;;  %s641_s3 = scalar_lea.vmem [#allocation17], %s2785_s17 }
 0x3ed   : > { %s648_s23 = scalar_lea.vmem [#allocation19], %s3239_s11  ;;  %s1280_s30 = sshll.u32 %s641_s3, 4  ;;  %s3040_s30 = int_to_ptr.vmem [resolvable:$true] %s1280_s30 }
 0x3ee   : > { %1702 = vst [vmem:[%s648_s23] sm:$0xff] %v1701_v35   ;;  %v1158_v36 = vpop.xlane.xlu0 %1157  ;;  %s1696_s28 = sshll.u32 %s2530_s22, 7  ;;  %s1296_s18 = sshll.u32 %s648_s23, 4  ;;  %s3054_s18 = int_to_ptr.vmem [resolvable:$true] %s1296_s18 }
 0x3ef   : > { %1995 = vrsqrt.f32 %v1158_v36  ;;  %s3240_s16 = sld [smem:[#allocation44_spill]]  ;;  %s3241_s22 = sld [smem:[#allocation45_spill]] }
 0x3f0   : > { %v1160_v37 = vpop.xlane.xlu1 %1159  ;;  %s3242_s23 = sshll.u32 %s2782_s4, 3  ;;  %s3243_s0 = sld [smem:[#allocation46_spill]] }
 0x3f1   : > { %1997 = vrsqrt.f32 %v1160_v37  ;;  %s3049_s14 = scalar_lea.vmem [#allocation20], %s3242_s23  ;;  %s1209_s10 = scalar_lea.sflag [#allocation18], %s2794_s2 }
 0x3f2   : > { %s1312_s27 = sshll.u32 %s3049_s14, 4  ;;  %s2255_s23 = scalar_lea.vmem %s3040_s30, 256  ;;  %s3062_s27 = int_to_ptr.vmem [resolvable:$true] %s1312_s27 }
 0x3f3   : > { %p2256_p12 = scmp.ne.s32.totalorder %s3040_s30, %s2255_s23  ;;  %s2424_s1 = smov [#allocation17]  }
 0x3f4   : > { %s2259_s5 = sshll.u32 %s2424_s1, 4  ;;  %s2260_s5 = int_to_ptr.vmem [resolvable:$false] %s2259_s5 }
 0x3f5   : > { %s3038_s24 = scalar_lea.hbm %s3240_s16, %s2914_s15  ;;  %s3045_s11 = scalar_lea.hbm %s3241_s22, %s1696_s28 }
 0x3f6   : > { %s3060_s17 = scalar_lea.hbm %s3243_s0, %s1696_s28  ;;  %p2257_p1 = pnand %p2256_p12, %p2682_p10 }
 0x3f7   : > { %s2261_s6 = scalar_lea.vmem %s2260_s5, 512  ;;  %p2262_p13 = scmp.lt.s32.totalorder %s3040_s30, %s2260_s5 }
 0x3f8   : > { %p2258_p2 = pneg %p2257_p1  ;;  %p2263_p0 = scmp.lt.s32.totalorder %s2261_s6, %s2255_s23 }
 0x3f9   : > { %v1996_v38 = vpop.eup %1995 }
 0x3fa   : > { %v3032_v39 = vmul.f32 %v1996_v38, %v2904_v22  ;;  %p2264_p4 = por %p2263_p0, %p2262_p13 }
 0x3fb   : > { %v1998_v40 = vpop.eup %1997 }
 0x3fc   : > { %1171 = vst [vmem:[%s641_s3] sm:$0xff] %v3032_v39  ;;  %v1164_v41 = vmul.f32 %v1998_v40, %v2906_v25  ;;  %p2265_p6 = pnand %p2264_p4, %p2258_p2 }
 0x3fe   : > { %1172 = vst [vmem:[%s641_s3 + $0x8] sm:$0xff] %v1164_v41  ;;  %v1706_v42 = vpack.c.bf16 %v1164_v41, %v3032_v39 }
 0x3ff   : > { %2268 = shalt.err (!%p2265_p6)
}
 0x400   : > { %s2269_s3 = scalar_lea.hbm %s3038_s24, 256  ;;  %s2273_s1 = scalar_lea.hbm %s3240_s16, 512 }
 0x401   : > { %p2270_p3 = scmp.ne.s32.totalorder %s3038_s24, %s2269_s3  ;;  %p2274_p8 = scmp.lt.u32.totalorder %s3038_s24, %s3240_s16 }
 0x402   : > { %p2275_p11 = scmp.lt.u32.totalorder %s2273_s1, %s2269_s3  ;;  %p2277_p12 = scmp.lt.u32.totalorder %s2269_s3, %s3038_s24 }
 0x403   : > { %p2271_p5 = pnand %p2270_p3, %p2682_p10 }
 0x404   : > { %p2276_p7 = por %p2275_p11, %p2274_p8 }
 0x405   : > { %p2272_p9 = pneg %p2271_p5 }
 0x406   : > { %p2278_p1 = por %p2277_p12, %p2276_p7 }
 0x408   : > { %p2279_p2 = pnand %p2278_p1, %p2272_p9 }
 0x40a   : > { %2282 = shalt.err (!%p2279_p2)
}
 0x40b   : > { %s3244_s6 = smov 8   ;;  %s3245_s23 = smov 128  }
 0x40c   : > { %1847 = dma.vmem_to_hbm [thread:$0]  (%p2682_p10), %s3040_s30, 256, %s3038_s24, %s1209_s10, %s3245_s23, %s3245_s23, %s3244_s6  }
 0x40d   : > { %s2283_s28 = scalar_lea.vmem %s3054_s18, 128  ;;  %s2425_s3 = smov [#allocation19]  }
 0x40e   : > { %p2284_p13 = scmp.ne.s32.totalorder %s3054_s18, %s2283_s28  ;;  %s2287_s15 = sshll.u32 %s2425_s3, 4  ;;  %s2288_s15 = int_to_ptr.vmem [resolvable:$false] %s2287_s15 }
 0x40f   : > { %s2289_s1 = scalar_lea.vmem %s2288_s15, 256  ;;  %p2290_p6 = scmp.lt.s32.totalorder %s3054_s18, %s2288_s15 }
 0x410   : > { %p2285_p0 = pnand %p2284_p13, %p2682_p10  ;;  %p2291_p3 = scmp.lt.s32.totalorder %s2289_s1, %s2283_s28 }
 0x412   : > { %p2286_p4 = pneg %p2285_p0  ;;  %p2292_p5 = por %p2291_p3, %p2290_p6 }
 0x414   : > { %p2293_p9 = pnand %p2292_p5, %p2286_p4 }
 0x416   : > { %2296 = shalt.err (!%p2293_p9)
}
 0x417   : > { %s2297_s30 = scalar_lea.hbm %s3045_s11, 128  ;;  %s2301_s5 = scalar_lea.hbm %s3241_s22, 256 }
 0x418   : > { %p2298_p8 = scmp.ne.s32.totalorder %s3045_s11, %s2297_s30  ;;  %p2302_p12 = scmp.lt.u32.totalorder %s3045_s11, %s3241_s22 }
 0x419   : > { %p2303_p1 = scmp.lt.u32.totalorder %s2301_s5, %s2297_s30  ;;  %p2305_p13 = scmp.lt.u32.totalorder %s2297_s30, %s3045_s11 }
 0x41a   : > { %p2299_p11 = pnand %p2298_p8, %p2682_p10 }
 0x41b   : > { %p2304_p2 = por %p2303_p1, %p2302_p12 }
 0x41c   : > { %p2300_p7 = pneg %p2299_p11 }
 0x41d   : > { %p2306_p0 = por %p2305_p13, %p2304_p2 }
 0x41f   : > { %p2307_p4 = pnand %p2306_p0, %p2300_p7 }
 0x421   : > { %2310 = shalt.err (!%p2307_p4)
}
 0x422   : > { %s2426_s28 = smov 64   ;;  %s2427_s3 = smov 4   ;;  %1707 = vst [vmem:[%s3049_s14] sm:$0xff] %v1706_v42  }
 0x423   : > { %1848 = dma.vmem_to_hbm [thread:$0]  (%p2682_p10), %s3054_s18, 128, %s3045_s11, %s1209_s10, %s2426_s28, %s2426_s28, %s2427_s3  }
 0x424   : > { %s1219_s15 = scalar_lea.sflag [#allocation21], %s2782_s4  ;;  %s2311_s1 = scalar_lea.vmem %s3062_s27, 128 }
 0x425   : > { %p2312_p6 = scmp.ne.s32.totalorder %s3062_s27, %s2311_s1  ;;  %s2428_s30 = smov [#allocation20]  }
 0x426   : > { %s2315_s24 = sshll.u32 %s2428_s30, 4  ;;  %s2316_s24 = int_to_ptr.vmem [resolvable:$false] %s2315_s24 }
 0x427   : > { %p2313_p3 = pnand %p2312_p6, %p2682_p10  ;;  %s2317_s9 = scalar_lea.vmem %s2316_s24, 256 }
 0x428   : > { %p2318_p9 = scmp.lt.s32.totalorder %s3062_s27, %s2316_s24  ;;  %p2319_p8 = scmp.lt.s32.totalorder %s2317_s9, %s2311_s1 }
 0x429   : > { %p2314_p5 = pneg %p2313_p3 }
 0x42a   : > { %p2320_p11 = por %p2319_p8, %p2318_p9 }
 0x42c   : > { %p2321_p7 = pnand %p2320_p11, %p2314_p5 }
 0x42e   : > { %2324 = shalt.err (!%p2321_p7)
}
 0x42f   : > { %s2325_s2 = scalar_lea.hbm %s3060_s17, 128  ;;  %s2329_s11 = scalar_lea.hbm %s3243_s0, 256 }
 0x430   : > { %p2326_p12 = scmp.ne.s32.totalorder %s3060_s17, %s2325_s2  ;;  %p2330_p13 = scmp.lt.u32.totalorder %s3060_s17, %s3243_s0 }
 0x431   : > { %p2331_p0 = scmp.lt.u32.totalorder %s2329_s11, %s2325_s2  ;;  %p2333_p6 = scmp.lt.u32.totalorder %s2325_s2, %s3060_s17 }
 0x432   : > { %p2327_p1 = pnand %p2326_p12, %p2682_p10 }
 0x433   : > { %p2332_p4 = por %p2331_p0, %p2330_p13 }
 0x434   : > { %p2328_p2 = pneg %p2327_p1 }
 0x435   : > { %p2334_p3 = por %p2333_p6, %p2332_p4 }
 0x437   : > { %p2335_p5 = pnand %p2334_p3, %p2328_p2 }
 0x439   : > { %2338 = shalt.err (!%p2335_p5)
}
 0x43a   : > { %1849 = dma.vmem_to_hbm [thread:$0]  (%p2682_p10), %s3062_s27, 128, %s3060_s17, %s1219_s15, %s2426_s28, %s2426_s28, %s2427_s3  }
 0x43b PF: > { %s3246_s6 = sld [smem:[#allocation31_spill]]  ;;  %s3247_s23 = sld [smem:[#allocation32_spill]] }
 0x43c   : > { %p3249_p8 = scmp.ge.s32.totalorder %s2405_s21, 2 }
 0x441   : > { %s1327_s1 = sand.u32 1, %s3246_s6   ;;  %p3248_p9 = scmp.ne.s32.totalorder %s3247_s23, 0 }
 0x442   : > { %s1328_s30 = scalar_lea.sflag [#allocation4], %s1327_s1 }
 0x443   : > { %p1877_p11 = pnand %p3249_p8, %p3248_p9 }
 0x445   : > { %2376 = dma.done.wait (!%p1877_p11), %s1328_s30, 256  }
 0x446   : > { %2378 = vsyncadd (!%p1877_p11), %s1328_s30, 4294967040  ;;  %s3250_s12 = sadd.s32 4294967294, %s2405_s21  }
 0x447   : > { %s1336_s24 = sand.u32 1, %s3250_s12  }
 0x448   : > { %s1337_s9 = scalar_lea.sflag [#allocation15], %s1336_s24 }
 0x449   : > { %2380 = dma.done.wait (!%p1877_p11), %s1337_s9, 512  }
 0x44a   : > { %2382 = vsyncadd (!%p1877_p11), %s1337_s9, 4294966784  ;;  %s1355_s4 = scalar_lea.sflag [#allocation18], %s1336_s24 }
 0x44b   : > { %2384 = dma.done.wait (!%p1877_p11), %s1355_s4, 384  }
 0x44c   : > { %2386 = vsyncadd (!%p1877_p11), %s1355_s4, 4294966912  ;;  %s1373_s27 = scalar_lea.sflag [#allocation21], %s1327_s1 }
 0x44d   : > { %2388 = dma.done.wait (!%p1877_p11), %s1373_s27, 128  }
 0x44e   : > { %2390 = vsyncadd (!%p1877_p11), %s1373_s27, 4294967168  ;;  %p43_p10 = scmp.ge.s32.totalorder %s2672_s13, 4   ;;  %s3251_s18 = smov %s2397_s19 }
 0x44f   : > { %s3252_s19 = smov %s2401_s20  ;;  %s3253_s20 = smov %s2688_s25 }
 0x450   : > { %s3254_s21 = smov %s2672_s13  ;;  %45 = sbr.rel (!%p43_p10) target bundleno = 30 (0x1e), region = 215 }
 0x457   :  { %1378 = vsyncpa [#allocation3], 1 }
 0x458   :  { %1380 = vsyncpa [#allocation3 + $0x1], 1 }
 0x459   :  { %1381 = vsyncpa [#allocation6], 1 }
 0x45a   :  { %1383 = vsyncpa [#allocation6 + $0x1], 1 }
 0x45b   :  { %1384 = vsyncpa [#allocation9], 1 }
 0x45c   :  { %1385 = vsyncpa [#allocation12], 1 }
 0x45d   :  { %1386 = vsyncpa [#allocation4], 1 }
 0x45e   :  { %1388 = vsyncpa [#allocation4 + $0x1], 1 }
 0x45f   :  { %1389 = vsyncpa [#allocation15], 1 }
 0x460   :  { %1391 = vsyncpa [#allocation15 + $0x1], 1 }
 0x461   :  { %1392 = vsyncpa [#allocation18], 1 }
 0x462   :  { %1394 = vsyncpa [#allocation18 + $0x1], 1 }
 0x463   :  { %1395 = vsyncpa [#allocation21], 1 }
 0x464   :  { %1397 = vsyncpa [#allocation21 + $0x1], 1 }

</bundles_post_ra>
